<compile_context>
chip_gen: v7x
topology: tpu7x:2x2x1
jax: 0.10.0
libtpu: 0.0.40
codegen_flags: <defaults>
</compile_context>

<pallas_src>
import functools

import jax
import jax.numpy as jnp
from jax.experimental import pallas as pl
from jax.experimental.pallas import tpu as pltpu


# ---------------------------------------------------------------------------
# helpers
# ---------------------------------------------------------------------------

def _round_up(x, m):
    return ((x + m - 1) // m) * m


def _pick_tile(n, max_tile):
    """Largest of (1024, 512, 256, 128) <= max_tile that divides n (n % 128 == 0)."""
    for t in (1024, 512, 256, 128):
        if t <= max_tile and n % t == 0:
            return t
    return 128


def _vmem_limit_bytes():
    """Scoped VMEM limit sized per TPU generation (v7x has 64 MiB/TC)."""
    try:
        cap = getattr(pltpu.get_tpu_info(), "vmem_capacity_bytes", 64 << 20)
    except Exception:  # pragma: no cover - conservative fallback
        cap = 64 << 20
    return int(min(cap // 2, 32 << 20))


# ---------------------------------------------------------------------------
# Pallas kernels
# ---------------------------------------------------------------------------

def xw_kernel(x_ref, w_ref, o_ref, acc_ref):
    """XW[i] = X[i] @ W1, k-reduced over feature tiles, stored bf16."""
    kf = pl.program_id(1)

    @pl.when(kf == 0)
    def _init():
        acc_ref[...] = jnp.zeros_like(acc_ref)

    acc_ref[...] += jnp.dot(x_ref[...], w_ref[...],
                            preferred_element_type=jnp.float32)

    @pl.when(kf == pl.num_programs(1) - 1)
    def _finalize():
        o_ref[...] = acc_ref[...].astype(o_ref.dtype)


def prop1_kernel(a_ref, xw_ref, w2_ref, b1_ref, o_ref, acc_ref):
    """G[i] = relu(sum_k A[i,k] @ XW[k] + b1) @ W2, stored bf16."""
    k = pl.program_id(1)

    @pl.when(k == 0)
    def _init():
        acc_ref[...] = jnp.zeros_like(acc_ref)

    acc_ref[...] += jnp.dot(a_ref[...], xw_ref[...],
                            preferred_element_type=jnp.float32)

    @pl.when(k == pl.num_programs(1) - 1)
    def _finalize():
        h1 = jnp.maximum(acc_ref[...] + b1_ref[...], 0.0)        # f32 epilogue
        o_ref[...] = jnp.dot(h1.astype(jnp.bfloat16), w2_ref[...],
                             preferred_element_type=jnp.float32).astype(o_ref.dtype)


def prop2_kernel(a_ref, g_ref, b2_ref, o_ref, acc_ref):
    """H2[i] = sum_k A[i,k] @ G[k] + b2, stored f32."""
    k = pl.program_id(1)

    @pl.when(k == 0)
    def _init():
        acc_ref[...] = jnp.zeros_like(acc_ref)

    acc_ref[...] += jnp.dot(a_ref[...], g_ref[...],
                            preferred_element_type=jnp.float32)

    @pl.when(k == pl.num_programs(1) - 1)
    def _finalize():
        o_ref[...] = (acc_ref[...] + b2_ref[...]).astype(o_ref.dtype)


def link_head_kernel(z_ref, w_ref, b_ref, o_ref, *, label_dim):
    """Linear head + log_softmax(dim=1); padded class lanes are masked out."""
    logits = jnp.dot(z_ref[...], w_ref[...],
                     preferred_element_type=jnp.float32) + b_ref[...]
    lane = jax.lax.broadcasted_iota(jnp.int32, logits.shape, 1)
    logits = jnp.where(lane < label_dim, logits, jnp.float32(-1e30))
    m = jnp.max(logits, axis=1, keepdims=True)
    shifted = logits - m
    lse = jnp.log(jnp.sum(jnp.exp(shifted), axis=1, keepdims=True))
    o_ref[...] = (shifted - lse).astype(o_ref.dtype)


# ---------------------------------------------------------------------------
# pallas_call wrappers
# ---------------------------------------------------------------------------

def feature_transform(x_bf16, w1_bf16, *, vmem_limit):
    n_pad, f_pad = x_bf16.shape
    h_pad = w1_bf16.shape[1]
    tm = _pick_tile(n_pad, 512)
    fk = _pick_tile(f_pad, 512)
    grid = (n_pad // tm, f_pad // fk)
    return pl.pallas_call(
        xw_kernel,
        out_shape=jax.ShapeDtypeStruct((n_pad, h_pad), jnp.bfloat16),
        grid_spec=pltpu.PrefetchScalarGridSpec(
            num_scalar_prefetch=0,
            grid=grid,
            in_specs=[
                pl.BlockSpec((tm, fk), lambda i, k: (i, k)),      # X[i, k]
                pl.BlockSpec((fk, h_pad), lambda i, k: (k, 0)),   # W1[k]
            ],
            out_specs=pl.BlockSpec((tm, h_pad), lambda i, k: (i, 0)),
            scratch_shapes=[pltpu.VMEM((tm, h_pad), jnp.float32)],
        ),
        compiler_params=pltpu.CompilerParams(
            dimension_semantics=("parallel", "arbitrary"),
            vmem_limit_bytes=vmem_limit,
        ),
    )(x_bf16, w1_bf16)


def propagate_layer1(adj_bf16, xw_bf16, w2_bf16, b1, *, vmem_limit):
    n_pad = adj_bf16.shape[0]
    h_pad = xw_bf16.shape[1]
    tm = _pick_tile(n_pad, 512)
    tk = _pick_tile(n_pad, 1024)
    grid = (n_pad // tm, n_pad // tk)
    return pl.pallas_call(
        prop1_kernel,
        out_shape=jax.ShapeDtypeStruct((n_pad, h_pad), jnp.bfloat16),
        grid_spec=pltpu.PrefetchScalarGridSpec(
            num_scalar_prefetch=0,
            grid=grid,
            in_specs=[
                pl.BlockSpec((tm, tk), lambda i, k: (i, k)),        # A[i, k]
                pl.BlockSpec((tk, h_pad), lambda i, k: (k, 0)),     # XW[k]
                pl.BlockSpec((h_pad, h_pad), lambda i, k: (0, 0)),  # W2
                pl.BlockSpec((1, h_pad), lambda i, k: (0, 0)),      # b1
            ],
            out_specs=pl.BlockSpec((tm, h_pad), lambda i, k: (i, 0)),
            scratch_shapes=[pltpu.VMEM((tm, h_pad), jnp.float32)],
        ),
        compiler_params=pltpu.CompilerParams(
            dimension_semantics=("parallel", "arbitrary"),
            vmem_limit_bytes=vmem_limit,
        ),
    )(adj_bf16, xw_bf16, w2_bf16, b1)


def propagate_layer2(adj_bf16, g_bf16, b2, *, vmem_limit):
    n_pad = adj_bf16.shape[0]
    h_pad = g_bf16.shape[1]
    tm = _pick_tile(n_pad, 512)
    tk = _pick_tile(n_pad, 1024)
    grid = (n_pad // tm, n_pad // tk)
    return pl.pallas_call(
        prop2_kernel,
        out_shape=jax.ShapeDtypeStruct((n_pad, h_pad), jnp.float32),
        grid_spec=pltpu.PrefetchScalarGridSpec(
            num_scalar_prefetch=0,
            grid=grid,
            in_specs=[
                pl.BlockSpec((tm, tk), lambda i, k: (i, k)),      # A[i, k]
                pl.BlockSpec((tk, h_pad), lambda i, k: (k, 0)),   # G[k]
                pl.BlockSpec((1, h_pad), lambda i, k: (0, 0)),    # b2
            ],
            out_specs=pl.BlockSpec((tm, h_pad), lambda i, k: (i, 0)),
            scratch_shapes=[pltpu.VMEM((tm, h_pad), jnp.float32)],
        ),
        compiler_params=pltpu.CompilerParams(
            dimension_semantics=("parallel", "arbitrary"),
            vmem_limit_bytes=vmem_limit,
        ),
    )(adj_bf16, g_bf16, b2)


def link_head(z, w, b, *, label_dim, q_tile, vmem_limit):
    q_pad, d_in = z.shape
    l_pad = w.shape[1]
    grid = (q_pad // q_tile,)
    return pl.pallas_call(
        functools.partial(link_head_kernel, label_dim=label_dim),
        out_shape=jax.ShapeDtypeStruct((q_pad, l_pad), jnp.float32),
        grid=grid,
        in_specs=[
            pl.BlockSpec((q_tile, d_in), lambda i: (i, 0)),
            pl.BlockSpec((d_in, l_pad), lambda i: (0, 0)),
            pl.BlockSpec((1, l_pad), lambda i: (0, 0)),
        ],
        out_specs=pl.BlockSpec((q_tile, l_pad), lambda i: (i, 0)),
        compiler_params=pltpu.CompilerParams(
            dimension_semantics=("parallel",),
            vmem_limit_bytes=vmem_limit,
        ),
    )(z, w, b)


# ---------------------------------------------------------------------------
# Model: parameters + forward
# ---------------------------------------------------------------------------

def glorot(key, shape):
    fan_in, fan_out = shape
    limit = (6.0 / (fan_in + fan_out)) ** 0.5
    return jax.random.uniform(key, shape, jnp.float32, -limit, limit)


def init_params(key, num_features, hidden, label_dim):
    k1, k2, k3, k4 = jax.random.split(key, 4)
    bound = 1.0 / (hidden * 2) ** 0.5
    return {
        # DiGCNConv: glorot weight, zero bias
        "conv1_w": glorot(k1, (num_features, hidden)),
        "conv1_b": jnp.zeros((hidden,), jnp.float32),
        "conv2_w": glorot(k2, (hidden, hidden)),
        "conv2_b": jnp.zeros((hidden,), jnp.float32),
        # nn.Linear(hidden*2, label_dim): stored (in, out) so forward is z @ W + b
        "lin_w": glorot(k3, (hidden * 2, label_dim)),
        "lin_b": jax.random.uniform(k4, (label_dim,), jnp.float32, -bound, bound),
    }


def digcn_link_prediction_forward(params, x, edge_index, query_edges, edge_weight,
                                  *, num_features, hidden, label_dim):
    num_nodes = x.shape[0]
    num_queries = query_edges.shape[0]

    n_pad = _round_up(num_nodes, 128)
    f_pad = _round_up(num_features, 128)
    h_pad = _round_up(hidden, 128)
    l_pad = _round_up(label_dim, 128)

    vmem_limit = _vmem_limit_bytes()

    # Dense adjacency A[dst, src] = edge_weight ("add" aggregation), bf16 stream.
    adj = jnp.zeros((n_pad, n_pad), jnp.float32)
    adj = adj.at[edge_index[1], edge_index[0]].add(edge_weight).astype(jnp.bfloat16)

    x_p = jnp.zeros((n_pad, f_pad), jnp.float32)
    x_p = x_p.at[:num_nodes, :num_features].set(x).astype(jnp.bfloat16)

    w1 = jnp.zeros((f_pad, h_pad), jnp.float32)
    w1 = w1.at[:num_features, :hidden].set(params["conv1_w"]).astype(jnp.bfloat16)
    b1 = jnp.zeros((1, h_pad), jnp.float32).at[0, :hidden].set(params["conv1_b"])
    w2 = jnp.zeros((h_pad, h_pad), jnp.float32)
    w2 = w2.at[:hidden, :hidden].set(params["conv2_w"]).astype(jnp.bfloat16)
    b2 = jnp.zeros((1, h_pad), jnp.float32).at[0, :hidden].set(params["conv2_b"])

    # 1) XW = X @ W1 computed once (bf16).
    xw = feature_transform(x_p, w1, vmem_limit=vmem_limit)          # (n_pad, h_pad) bf16
    # 2) G = relu(A @ XW + b1) @ W2 (bf16, W2 multiply fused into the epilogue).
    g = propagate_layer1(adj, xw, w2, b1, vmem_limit=vmem_limit)    # (n_pad, h_pad) bf16
    # 3) H2 = A @ G + b2 (kept f32 for the head; bf16 writeback is a minor follow-up).
    h2 = propagate_layer2(adj, g, b2, vmem_limit=vmem_limit)        # (n_pad, h_pad) f32

    # Gather query endpoints and concatenate (XLA gather; see TODO above).
    z = jnp.concatenate([h2[query_edges[:, 0]], h2[query_edges[:, 1]]], axis=-1)
    q_tile = 256 if num_queries > 512 else _round_up(num_queries, 8)
    q_pad = _round_up(num_queries, q_tile)
    z_p = jnp.zeros((q_pad, 2 * h_pad), jnp.float32).at[:num_queries].set(z)

    # Linear head weights embedded into the padded/concat layout.
    w_lin = jnp.zeros((2 * h_pad, l_pad), jnp.float32)
    w_lin = w_lin.at[:hidden, :label_dim].set(params["lin_w"][:hidden])
    w_lin = w_lin.at[h_pad:h_pad + hidden, :label_dim].set(params["lin_w"][hidden:])
    b_lin = jnp.zeros((1, l_pad), jnp.float32).at[0, :label_dim].set(params["lin_b"])

    out = link_head(z_p, w_lin, b_lin, label_dim=label_dim,
                    q_tile=q_tile, vmem_limit=vmem_limit)           # (q_pad, l_pad)
    return out[:num_queries, :label_dim]


def reference_forward(params, x, edge_index, query_edges, edge_weight):
    """Pure-JAX f32 reference of the same forward pass (for a sanity check)."""
    n = x.shape[0]
    adj = jnp.zeros((n, n), jnp.float32).at[edge_index[1], edge_index[0]].add(edge_weight)
    h = jnp.maximum(adj @ (x @ params["conv1_w"]) + params["conv1_b"], 0.0)
    h = adj @ (h @ params["conv2_w"]) + params["conv2_b"]
    z = jnp.concatenate([h[query_edges[:, 0]], h[query_edges[:, 1]]], axis=-1)
    logits = z @ params["lin_w"] + params["lin_b"]
    return jax.nn.log_softmax(logits, axis=1)


# ---------------------------------------------------------------------------
# Demo
# ---------------------------------------------------------------------------

if __name__ == "__main__":
    num_nodes = 300          # n_pad = 384 -> 3x3 row/k tile grid (exercises accumulator)
    num_features = 20
    hidden = 32
    label_dim = 2
    num_edges = 1000
    num_queries = 20

    key = jax.random.PRNGKey(0)
    k_params, k_x, k_src, k_dst, k_w, k_q = jax.random.split(key, 6)

    params = init_params(k_params, num_features, hidden, label_dim)

    x = jax.random.normal(k_x, (num_nodes, num_features), jnp.float32)
    src = jax.random.randint(k_src, (num_edges,), 0, num_nodes)
    dst = jax.random.randint(k_dst, (num_edges,), 0, num_nodes)
    edge_index = jnp.stack([src, dst], axis=0).astype(jnp.int32)
    edge_weight = jax.random.uniform(k_w, (num_edges,), jnp.float32, 0.1, 1.0)
    query_edges = jax.random.randint(k_q, (num_queries, 2), 0, num_nodes).astype(jnp.int32)

    out = digcn_link_prediction_forward(
        params, x, edge_index, query_edges, edge_weight,
        num_features=num_features, hidden=hidden, label_dim=label_dim)
    out = jax.block_until_ready(out)

    assert out.shape == (num_queries, label_dim)
    # sanity 1: rows of log_softmax exponentiate to ~1
    row_sums = jnp.exp(out).sum(axis=1)
    assert bool(jnp.all(jnp.abs(row_sums - 1.0) < 1e-4))
    # sanity 2: matches the pure-JAX f32 reference within bf16 tolerance
    ref = reference_forward(params, x, edge_index, query_edges, edge_weight)
    max_diff = float(jnp.max(jnp.abs(out - ref)))
    assert max_diff < 0.25, f"max diff vs reference = {max_diff}"

    print("KERNEL_OK")
</pallas_src>

<mosaic_0001>
module attributes {stable_mosaic.version = 11 : i64} {
  func.func @xw_kernel(%arg0: i32, %arg1: i32, %arg2: memref<128x128xbf16, #tpu.memory_space<vmem>>, %arg3: memref<128x128xbf16, #tpu.memory_space<vmem>>, %arg4: memref<128x128xbf16, #tpu.memory_space<vmem>>, %arg5: memref<128x128xf32, #tpu.memory_space<vmem>>) attributes {dimension_semantics = [#tpu.dimension_semantics<parallel>, #tpu.dimension_semantics<arbitrary>], iteration_bounds = array<i64: 3, 1>, scalar_prefetch = 0 : i64, scratch_operands = 1 : i64, tpu.core_type = #tpu.core_type<tc>, window_params = [{transform_indices = @transform_0, window_bounds = array<i64: 128, 128>}, {transform_indices = @transform_1, window_bounds = array<i64: 128, 128>}, {transform_indices = @transform_2, window_bounds = array<i64: 128, 128>}]} {
    %c0_i32 = arith.constant 0 : i32
    %0 = arith.cmpi eq, %arg1, %c0_i32 : i32
    %1 = arith.extui %0 : i1 to i32
    %c0_i32_0 = arith.constant 0 : i32
    %2 = arith.cmpi ne, %1, %c0_i32_0 : i32
    scf.if %2 {
      %cst_10 = arith.constant 0.000000e+00 : f32
      %12 = vector.broadcast %cst_10 : f32 to vector<128x128xf32>
      %c0_11 = arith.constant 0 : index
      %c0_12 = arith.constant 0 : index
      %13 = vector.load %arg5[%c0_11, %c0_12] : memref<128x128xf32, #tpu.memory_space<vmem>>, vector<128x128xf32>
      tpu.vector_store %arg5[%c0_11, %c0_12], %12 {strides = array<i32>} : memref<128x128xf32, #tpu.memory_space<vmem>>, vector<128x128xf32>,
    } else {
    }
    %c0 = arith.constant 0 : index
    %c0_1 = arith.constant 0 : index
    %3 = vector.load %arg5[%c0, %c0_1] : memref<128x128xf32, #tpu.memory_space<vmem>>, vector<128x128xf32>
    %c0_2 = arith.constant 0 : index
    %c0_3 = arith.constant 0 : index
    %4 = vector.load %arg2[%c0_2, %c0_3] : memref<128x128xbf16, #tpu.memory_space<vmem>>, vector<128x128xbf16>
    %c0_4 = arith.constant 0 : index
    %c0_5 = arith.constant 0 : index
    %5 = vector.load %arg3[%c0_4, %c0_5] : memref<128x128xbf16, #tpu.memory_space<vmem>>, vector<128x128xbf16>
    %cst = arith.constant dense<0.000000e+00> : vector<128x128xf32>
    %6 = tpu.matmul %4, %5, %cst {dimension_numbers = #tpu.dot_dimension_numbers<[1], [0], [0], [1], [0, 0, 1, 1], [], []>} : vector<128x128xbf16>, vector<128x128xbf16>, vector<128x128xf32> -> vector<128x128xf32>
    %7 = arith.addf %3, %6 : vector<128x128xf32>
    %c0_6 = arith.constant 0 : index
    %c0_7 = arith.constant 0 : index
    %8 = vector.load %arg5[%c0_6, %c0_7] : memref<128x128xf32, #tpu.memory_space<vmem>>, vector<128x128xf32>
    tpu.vector_store %arg5[%c0_6, %c0_7], %7 {strides = array<i32>} : memref<128x128xf32, #tpu.memory_space<vmem>>, vector<128x128xf32>,
    %c0_i32_8 = arith.constant 0 : i32
    %9 = arith.cmpi eq, %arg1, %c0_i32_8 : i32
    %10 = arith.extui %9 : i1 to i32
    %c0_i32_9 = arith.constant 0 : i32
    %11 = arith.cmpi ne, %10, %c0_i32_9 : i32
    scf.if %11 {
      %c0_10 = arith.constant 0 : index
      %c0_11 = arith.constant 0 : index
      %12 = vector.load %arg5[%c0_10, %c0_11] : memref<128x128xf32, #tpu.memory_space<vmem>>, vector<128x128xf32>
      %13 = arith.truncf %12 : vector<128x128xf32> to vector<128x128xbf16>
      %c0_12 = arith.constant 0 : index
      %c0_13 = arith.constant 0 : index
      %14 = vector.load %arg4[%c0_12, %c0_13] : memref<128x128xbf16, #tpu.memory_space<vmem>>, vector<128x128xbf16>
      tpu.vector_store %arg4[%c0_12, %c0_13], %13 {strides = array<i32>} : memref<128x128xbf16, #tpu.memory_space<vmem>>, vector<128x128xbf16>,
    } else {
    }
    return
  }
  func.func @transform_0(%arg0: i32, %arg1: i32) -> (i32, i32) {
    %c0_i32 = arith.constant 0 : i32
    return %arg0, %arg1 : i32, i32
  }
  func.func @transform_1(%arg0: i32, %arg1: i32) -> (i32, i32) {
    %c0_i32 = arith.constant 0 : i32
    %c0_i32_0 = arith.constant 0 : i32
    return %arg1, %c0_i32 : i32, i32
  }
  func.func @transform_2(%arg0: i32, %arg1: i32) -> (i32, i32) {
    %c0_i32 = arith.constant 0 : i32
    %c0_i32_0 = arith.constant 0 : i32
    return %arg0, %c0_i32 : i32, i32
  }
}

</mosaic_0001>

<bundles_post_ra>
// kernel: tpu_custom_call.1
= control target key start
LH: loop header
LB: loop body
LE: loop exit
PB: predicated region body
PF: predicated region fallthrough
CT: control target
= control target key end

     0   :  { %7 = vsyncpa [#allocation4], 0  ;;  %s1381_s0 = inlined_call_operand.hbm [shape: bf16[384,128], index: 0, kind: input, shape index: {}]   ;;  %s1382_s1 = inlined_call_operand.hbm [shape: bf16[128,128], index: 1, kind: input, shape index: {}]   ;;  %s1383_s2 = inlined_call_operand.hbm [shape: bf16[384,128], index: 2, kind: output, shape index: {}]  }
   0x1   :  { %9 = vsyncpa [#allocation4 + $0x1], 0 }
   0x2   :  { %10 = vsyncpa [#allocation7], 0 }
   0x3   :  { %11 = vsyncpa [#allocation5], 0 }
   0x4   :  { %13 = vsyncpa [#allocation5 + $0x1], 0  ;;  %s1144_s9 = smov 0   ;;  %s1146_s10 = smov 0  }
   0x5   :  { %s1148_s11 = smov 0   ;;  %s1150_s12 = smov 0  }
   0x6   :  { %s1152_s13 = smov 0   ;;  %s1154_s14 = smov 0  }
   0x7 LB: > { %s705_s15 = sadd.s32 4294967295, %s1120_s14   ;;  %s706_s16 = sadd.s32 4294967294, %s1120_s14   ;;  %s1120_s14 = sphi %s1154_s14, %s19_s14   ;;  %s1116_s13 = sphi %s1152_s13, %s1406_s13   ;;  %s1112_s12 = sphi %s1150_s12, %s1405_s12   ;;  %s1108_s11 = sphi %s1148_s11, %s1404_s11   ;;  %s1104_s10 = sphi %s1146_s10, %s1403_s10   ;;  %s1100_s9 = sphi %s1144_s9, %s1402_s9  }
   0x8   : > { %p53_p0 = scmp.ne.s32.totalorder %s1104_s10, %s1100_s9  ;;  %p1178_p1 = scmp.eq.s32.totalorder %s705_s15, 0 }
   0x9   : > { %p1182_p2 = scmp.eq.s32.totalorder %s705_s15, 2  ;;  %p109_p3 = scmp.eq.s32.totalorder %s706_s16, 2 }
   0xa   : > { %s1388_s17 = scalar_select %p1178_p1, 1, 0 }
   0xb   : > { %s1389_s18 = scalar_select %p1182_p2, 1, 0 }
   0xc   : > { %p1188_p4 = por %p1178_p1, %p53_p0  ;;  %p707_p5 = scmp.ge.s32.totalorder %s1120_s14, 1 }
   0xd   : > { %p1193_p6 = por %p109_p3, %p53_p0  ;;  %p116_p7 = scmp.lt.s32.totalorder %s1120_s14, 4 }
   0xe   : > { %s1390_s19 = scalar_select %p1188_p4, 1, 0 }
   0xf   : > { %s1391_s20 = scalar_select %p1193_p6, 1, 0 }
  0x10   : > { %p1198_p8 = pnand %p707_p5, %p116_p7  ;;  %s1122_s22 = smov [#allocation6]  }
  0x11   : > { %s131_s23 = sshll.u32 %s1122_s22, 4  ;;  %s31_s25 = sadd.s32 1, %s1116_s13  ;;  %s132_s23 = int_to_ptr.vmem [resolvable:$true] %s131_s23 }
  0x12   : > { %s1392_s21 = scalar_select %p1198_p8, 1, 0 }
  0x13   : > { %p891_p9 = pneg %p1198_p8  ;;  %s976_s28 = scalar_lea.hbm %s1382_s1, 1024 }
  0x14   : > { %p977_p11 = scmp.ne.s32.totalorder %s1382_s1, %s976_s28  ;;  %p983_p3 = scmp.lt.u32.totalorder %s976_s28, %s1382_s1 }
  0x15   : > { %p1206_p10 = pnand %p891_p9, %p1178_p1 }
  0x17   : > { %p978_p12 = pneg %p1206_p10 }
  0x19   : > { %p979_p13 = pnand %p978_p12, %p977_p11 }
  0x1b   : > { %p980_p0 = pneg %p979_p13 }
  0x1d   : > { %p985_p5 = pnand %p983_p3, %p980_p0 }
  0x1f   : > { %988 = shalt.err (!%p985_p5)
}
  0x20   : > { %s989_s5 = scalar_lea.vmem %s132_s23, 1024  ;;  %p997_p1 = scmp.lt.s32.totalorder %s132_s23, %s132_s23 }
  0x21   : > { %p990_p7 = scmp.ne.s32.totalorder %s132_s23, %s989_s5  ;;  %p998_p4 = scmp.lt.s32.totalorder %s989_s5, %s989_s5 }
  0x23   : > { %p992_p9 = pnand %p990_p7, %p978_p12  ;;  %p999_p8 = por %p998_p4, %p997_p1 }
  0x25   : > { %p993_p6 = pneg %p992_p9 }
  0x27   : > { %p1000_p2 = pnand %p999_p8, %p993_p6 }
  0x29   : > { %1003 = shalt.err (!%p1000_p2)
}
  0x2a   : > { %s1123_s6 = smov 64   ;;  %s1124_s7 = smov 4  }
  0x2b   : > { %894 = dma.hbm_to_vmem [thread:$0]  (!%p1206_p10), %s1382_s1, 1024, %s132_s23, [#allocation7], %s1123_s6, %s1123_s6, %s1124_s7  }
  0x2c   : > { %p33_p1 = scmp.ge.s32.totalorder %s31_s25, 3  ;;  %s40_s16 = sadd.s32 1, %s1108_s11 }
  0x2d   : > { %p47_p2 = scmp.ne.s32.totalorder %s1108_s11, %s1104_s10  ;;  %p48_p4 = scmp.eq.s32.totalorder %s1120_s14, 0 }
  0x2e   : > { %s1408_s25 = smov (%p33_p1, %s31_s25), 0  ;;  %p1395_p8 = scmp.ne.s32.totalorder %s1389_s18, 0 }
  0x2f   : > { %p1236_p6 = por %p48_p4, %p47_p2  ;;  %s35_s26 = ssub.s32 %s1116_s13, %s1408_s25 }
  0x30   : > { %p1242_p11 = por %p1395_p8, %p47_p2  ;;  %p904_p12 = scmp.lt.s32.totalorder %s1120_s14, 3 }
  0x31   : > { %p38_p10 = scmp.eq.s32.totalorder %s35_s26, 0  ;;  %s145_s23 = sand.u32 1, %s1108_s11  }
  0x32   : > { %s710_s27 = sshll.u32 %s145_s23, 6  ;;  %s754_s29 = sshll.u32 %s1116_s13, 10 }
  0x33   : > { %s1251_s28 = scalar_select %p38_p10, %s1108_s11, %s40_s16  }
  0x34   : > { %s1257_s4 = scalar_lea.hbm %s1381_s0, %s754_s29  ;;  %s149_s18 = scalar_lea.vmem [#allocation3], %s710_s27 }
  0x35   : > { %s157_s5 = sshll.u32 %s149_s18, 4  ;;  %p1263_p13 = pnand %p904_p12, %p1236_p6  ;;  %s1259_s5 = int_to_ptr.vmem [resolvable:$true] %s157_s5 }
  0x36   : > { %s1267_s15 = scalar_lea.sflag [#allocation4], %s145_s23  ;;  %s1004_s16 = scalar_lea.hbm %s1257_s4, 1024 }
  0x37   : > { %p1005_p0 = scmp.ne.s32.totalorder %s1257_s4, %s1004_s16  ;;  %p1006_p3 = pneg %p1263_p13 }
  0x38   : > { %s1009_s22 = scalar_lea.hbm %s1381_s0, 3072  ;;  %p1010_p9 = scmp.lt.u32.totalorder %s1257_s4, %s1381_s0 }
  0x39   : > { %p1007_p5 = pnand %p1006_p3, %p1005_p0  ;;  %p1011_p1 = scmp.lt.u32.totalorder %s1009_s22, %s1004_s16 }
  0x3a   : > { %p1013_p4 = scmp.lt.u32.totalorder %s1004_s16, %s1257_s4 }
  0x3b   : > { %p1008_p7 = pneg %p1007_p5  ;;  %p1012_p2 = por %p1011_p1, %p1010_p9 }
  0x3d   : > { %p1014_p6 = por %p1013_p4, %p1012_p2 }
  0x3f   : > { %p1015_p8 = pnand %p1014_p6, %p1008_p7 }
  0x41   : > { %1018 = shalt.err (!%p1015_p8)
}
  0x42   : > { %s1019_s23 = scalar_lea.vmem %s1259_s5, 1024  ;;  %s1125_s3 = smov [#allocation3]  }
  0x43   : > { %p1020_p12 = scmp.ne.s32.totalorder %s1259_s5, %s1019_s23  ;;  %s1024_s18 = sshll.u32 %s1125_s3, 4  ;;  %s1025_s18 = int_to_ptr.vmem [resolvable:$false] %s1024_s18 }
  0x44   : > { %s1026_s26 = scalar_lea.vmem %s1025_s18, 2048  ;;  %p1027_p5 = scmp.lt.s32.totalorder %s1259_s5, %s1025_s18 }
  0x45   : > { %p1022_p10 = pnand %p1020_p12, %p1006_p3  ;;  %p1028_p9 = scmp.lt.s32.totalorder %s1026_s26, %s1019_s23 }
  0x47   : > { %p1023_p0 = pneg %p1022_p10  ;;  %p1029_p1 = por %p1028_p9, %p1027_p5 }
  0x49   : > { %p1030_p2 = pnand %p1029_p1, %p1023_p0 }
  0x4b   : > { %1033 = shalt.err (!%p1030_p2)
}
  0x4c   : > { %898 = dma.hbm_to_vmem [thread:$0]  (!%p1263_p13), %s1257_s4, 1024, %s1259_s5, %s1267_s15, %s1123_s6, %s1123_s6, %s1124_s7  }
  0x4d   : > { %p1398_p3 = scmp.ne.s32.totalorder %s1392_s21, 0 }
  0x4e   : > { %s1301_s16 = sand.u32 (!%p1398_p3), 1, %s1104_s10   ;;  %p1399_p7 = scmp.ne.s32.totalorder (!%p1398_p3), %s1390_s19, 0 }
  0x4f   : > { %169 = sbr.rel (%p1398_p3) target bundleno = 363 (0x16b), region = 28  ;;  %s714_s27 = sshll.u32 (!%p1398_p3), %s1301_s16, 6 }
  0x50   : > { %s172_s22 = scalar_lea.sflag (!%p1398_p3), [#allocation4], %s1301_s16  ;;  %s1307_s8 = scalar_lea.vmem (!%p1398_p3), [#allocation3], %s714_s27 }
  0x56   : > { %1087 = dma.done.wait (%p1399_p7), %s172_s22, 1024  }
  0x57   : > { %1089 = vsyncadd (%p1399_p7), %s172_s22, 4294966272  ;;  %p1400_p13 = scmp.ne.s32.totalorder %s1388_s17, 0 }
  0x59   : > { %1091 = dma.done.wait (%p1400_p13), [#allocation7], 1024  }
  0x5a   : > { %1093 = vsyncadd (%p1400_p13), [#allocation7], 4294966272  ;;  %v960_v0 = vld [vmem:[#allocation6] sm:$0xff]   ;;  %v961_v1 = vld [vmem:[#allocation6 + $0x8] sm:$0xff]   ;;  %s199_s17 = scalar_lea.vmem [#allocation8], %s714_s27  ;;  %s771_s21 = sshll.u32 %s1112_s12, 10 }
  0x5b   : > { %835 = vmatprep.subr.bf16.mxu0 %v960_v0  ;;  %867 = vmatprep.subr.bf16.mxu1 %v960_v0  ;;  %v962_v2 = vld [vmem:[#allocation6 + $0x10] sm:$0xff]   ;;  %v963_v3 = vld [vmem:[#allocation6 + $0x18] sm:$0xff]   ;;  %v968_v4 = vld [vmem:[%s1307_s8] sm:$0xff]   ;;  %s610_s19 = sshll.u32 %s199_s17, 4  ;;  %s1333_s4 = scalar_lea.hbm %s1383_s2, %s771_s21  ;;  %s1328_s19 = int_to_ptr.vmem [resolvable:$true] %s610_s19 }
  0x5c   : > { %836 = vmatpush3.bf16.msra.mxu0 %v960_v0  ;;  %875 = vmatpush3.bf16.msra.mxu1 %v960_v0  ;;  %v969_v5 = vld [vmem:[%s1307_s8 + $0x20] sm:$0xff]   ;;  %v965_v7 = vld [vmem:[#allocation6 + $0x28] sm:$0xff]   ;;  %v966_v8 = vld [vmem:[#allocation6 + $0x30] sm:$0xff]   ;;  %s597_s12 = scalar_lea.sflag [#allocation5], %s1301_s16  ;;  %s1034_s5 = scalar_lea.vmem %s1328_s19, 1024 }
  0x5d   : > { %837 = vmatprep.subr.bf16.mxu0 %v961_v1  ;;  %868 = vmatprep.subr.bf16.mxu1 %v961_v1  ;;  %v964_v6 = vld [vmem:[#allocation6 + $0x20] sm:$0xff]   ;;  %v967_v9 = vld [vmem:[#allocation6 + $0x38] sm:$0xff]   ;;  %v970_v10 = vld [vmem:[%s1307_s8 + $0x8] sm:$0xff]   ;;  %p1035_p4 = scmp.ne.s32.totalorder %s1328_s19, %s1034_s5  ;;  %s1126_s15 = smov [#allocation8]  }
  0x5e   : > { %851 = vmatprep.mubr.bf16.mxu0 %v968_v4  ;;  %859 = vmatprep.mubr.bf16.mxu1 %v969_v5  ;;  %v971_v11 = vld [vmem:[%s1307_s8 + $0x28] sm:$0xff]   ;;  %v972_v12 = vld [vmem:[%s1307_s8 + $0x10] sm:$0xff]   ;;  %v974_v14 = vld [vmem:[%s1307_s8 + $0x18] sm:$0xff]   ;;  %s1038_s29 = sshll.u32 %s1126_s15, 4  ;;  %s1039_s29 = int_to_ptr.vmem [resolvable:$false] %s1038_s29 }
  0x5f   : > { %v973_v13 = vld [vmem:[%s1307_s8 + $0x30] sm:$0xff]   ;;  %v975_v15 = vld [vmem:[%s1307_s8 + $0x38] sm:$0xff]   ;;  %p1036_p6 = pnand %p1035_p4, %p1242_p11  ;;  %s1040_s30 = scalar_lea.vmem %s1039_s29, 2048 }
  0x60   : > { %838 = vmatpush3.bf16.msra.mxu0 %v961_v1  ;;  %876 = vmatpush3.bf16.msra.mxu1 %v961_v1  ;;  %p1041_p12 = scmp.lt.s32.totalorder %s1328_s19, %s1039_s29  ;;  %p1042_p10 = scmp.lt.s32.totalorder %s1040_s30, %s1034_s5 }
  0x61   : > { %839 = vmatprep.subr.bf16.mxu0 %v962_v2  ;;  %869 = vmatprep.subr.bf16.mxu1 %v962_v2  ;;  %p1037_p8 = pneg %p1036_p6 }
  0x62   : > { %p1043_p0 = por %p1042_p10, %p1041_p12 }
  0x64   : > { %840 = vmatpush3.bf16.msra.mxu0 %v962_v2  ;;  %877 = vmatpush3.bf16.msra.mxu1 %v962_v2  ;;  %p1044_p5 = pnand %p1043_p0, %p1037_p8 }
  0x65   : > { %841 = vmatprep.subr.bf16.mxu0 %v963_v3  ;;  %870 = vmatprep.subr.bf16.mxu1 %v963_v3 }
  0x68   : > { %842 = vmatpush3.bf16.msra.mxu0 %v963_v3  ;;  %878 = vmatpush3.bf16.msra.mxu1 %v963_v3 }
  0x69   : > { %843 = vmatprep.subr.bf16.mxu0 %v964_v6  ;;  %871 = vmatprep.subr.bf16.mxu1 %v964_v6 }
  0x6c   : > { %844 = vmatpush3.bf16.msra.mxu0 %v964_v6  ;;  %879 = vmatpush3.bf16.msra.mxu1 %v964_v6 }
  0x6d   : > { %845 = vmatprep.subr.bf16.mxu0 %v965_v7  ;;  %872 = vmatprep.subr.bf16.mxu1 %v965_v7 }
  0x70   : > { %846 = vmatpush3.bf16.msra.mxu0 %v965_v7  ;;  %880 = vmatpush3.bf16.msra.mxu1 %v965_v7 }
  0x71   : > { %847 = vmatprep.subr.bf16.mxu0 %v966_v8  ;;  %873 = vmatprep.subr.bf16.mxu1 %v966_v8 }
  0x74   : > { %848 = vmatpush3.bf16.msra.mxu0 %v966_v8  ;;  %881 = vmatpush3.bf16.msra.mxu1 %v966_v8 }
  0x75   : > { %849 = vmatprep.subr.bf16.mxu0 %v967_v9  ;;  %874 = vmatprep.subr.bf16.mxu1 %v967_v9 }
  0x78   : > { %850 = vmatpush3.bf16.msra.mxu0 %v967_v9  ;;  %882 = vmatpush3.bf16.msra.mxu1 %v967_v9 }
  0x7b   : > { %852 = vmatmul.mubr.bf16.vlgmr.msra.gmra.mrb[0].mxu0 %v970_v10  ;;  %860 = vmatmul.mubr.bf16.vlgmr.msra.gmra.mrb[0].mxu1 %v971_v11 }
  0x7c   : > { %855 = vmatprep.mubr.bf16.mxu0 %v972_v12  ;;  %863 = vmatprep.mubr.bf16.mxu1 %v973_v13 }
  0x83   : > { %856 = vmatmul.mubr.bf16.gmra.mrb[4].mxu0 %v974_v14  ;;  %864 = vmatmul.mubr.bf16.gmra.mrb[4].mxu1 %v975_v15 }
 0x14e   : > { %v853_v16 = vpop.f32.mrb[0].mxu0  ;;  %v861_v17 = vpop.f32.mrb[0].mxu1 }
 0x14f   : > { %v402_v18 = vpop.f32.mrb[1].mxu0  ;;  %v434_v19 = vpop.f32.mrb[1].mxu1 }
 0x150   : > { %v854_v20 = vpop.f32.mrb[2].mxu0  ;;  %v862_v21 = vpop.f32.mrb[2].mxu1 }
 0x151   : > { %v780_v22 = vpack.c.bf16 %v854_v20, %v853_v16  ;;  %v800_v23 = vpack.c.bf16 %v862_v21, %v861_v17  ;;  %v405_v24 = vpop.f32.mrb[3].mxu0  ;;  %v437_v25 = vpop.f32.mrb[3].mxu1 }
 0x152   : > { %v775_v26 = vpack.c.bf16 %v405_v24, %v402_v18  ;;  %v795_v27 = vpack.c.bf16 %v437_v25, %v434_v19 }
 0x153   : > { %812 = vst [vmem:[%s199_s17 + $0x8] sm:$0xff] %v780_v22   ;;  %816 = vst [vmem:[%s199_s17 + $0x28] sm:$0xff] %v800_v23  }
 0x154   : > { %776 = vst [vmem:[%s199_s17] sm:$0xff] %v775_v26   ;;  %815 = vst [vmem:[%s199_s17 + $0x20] sm:$0xff] %v795_v27  }
 0x156   : > { %v857_v28 = vpop.f32.mrb[4].mxu0  ;;  %v865_v29 = vpop.f32.mrb[4].mxu1 }
 0x157   : > { %v418_v30 = vpop.f32.mrb[5].mxu0  ;;  %v450_v31 = vpop.f32.mrb[5].mxu1 }
 0x158   : > { %v858_v32 = vpop.f32.mrb[6].mxu0  ;;  %v866_v33 = vpop.f32.mrb[6].mxu1 }
 0x159   : > { %v790_v34 = vpack.c.bf16 %v858_v32, %v857_v28  ;;  %v810_v35 = vpack.c.bf16 %v866_v33, %v865_v29  ;;  %v421_v36 = vpop.f32.mrb[7].mxu0  ;;  %v453_v37 = vpop.f32.mrb[7].mxu1 }
 0x15a   : > { %v785_v38 = vpack.c.bf16 %v421_v36, %v418_v30  ;;  %v805_v39 = vpack.c.bf16 %v453_v37, %v450_v31 }
 0x15b   : > { %814 = vst [vmem:[%s199_s17 + $0x18] sm:$0xff] %v790_v34   ;;  %818 = vst [vmem:[%s199_s17 + $0x38] sm:$0xff] %v810_v35  }
 0x15c   : > { %813 = vst [vmem:[%s199_s17 + $0x10] sm:$0xff] %v785_v38   ;;  %817 = vst [vmem:[%s199_s17 + $0x30] sm:$0xff] %v805_v39  }
 0x15d   : > { %1047 = shalt.err (!%p1044_p5)
}
 0x15e   : > { %s1048_s23 = scalar_lea.hbm %s1333_s4, 1024  ;;  %s1052_s26 = scalar_lea.hbm %s1383_s2, 3072 }
 0x15f   : > { %p1049_p9 = scmp.ne.s32.totalorder %s1333_s4, %s1048_s23  ;;  %p1053_p3 = scmp.lt.u32.totalorder %s1333_s4, %s1383_s2 }
 0x160   : > { %p1054_p7 = scmp.lt.u32.totalorder %s1052_s26, %s1048_s23  ;;  %p1056_p4 = scmp.lt.u32.totalorder %s1048_s23, %s1333_s4 }
 0x161   : > { %p1050_p1 = pnand %p1049_p9, %p1242_p11 }
 0x162   : > { %p1055_p13 = por %p1054_p7, %p1053_p3 }
 0x163   : > { %p1051_p2 = pneg %p1050_p1 }
 0x164   : > { %p1057_p6 = por %p1056_p4, %p1055_p13 }
 0x166   : > { %p1058_p8 = pnand %p1057_p6, %p1051_p2 }
 0x168   : > { %1061 = shalt.err (!%p1058_p8)
}
 0x169   : > { %s1127_s8 = smov 64   ;;  %s1128_s17 = smov 4  }
 0x16a   : > { %889 = dma.vmem_to_hbm [thread:$0]  (%p1242_p11), %s1328_s19, 1024, %s1333_s4, %s597_s12, %s1127_s8, %s1127_s8, %s1128_s17  }
 0x16b PF: > { %p906_p12 = scmp.ge.s32.totalorder %s1120_s14, 2  ;;  %s625_s21 = sand.u32 1, %s1100_s9  }
 0x16c   : > { %p1401_p10 = scmp.ne.s32.totalorder %s1391_s20, 0  ;;  %s626_s6 = scalar_lea.sflag [#allocation5], %s625_s21 }
 0x16e   : > { %p900_p0 = pnand %p906_p12, %p1401_p10 }
 0x170   : > { %1095 = dma.done.wait (!%p900_p0), %s626_s6, 1024  }
 0x171   : > { %1097 = vsyncadd (!%p900_p0), %s626_s6, 4294966272  ;;  %s19_s14 = sadd.s32 1, %s1120_s14   ;;  %s1402_s9 = smov %s1104_s10 }
 0x172   : > { %p16_p5 = scmp.ge.s32.totalorder %s19_s14, 5   ;;  %s1403_s10 = smov %s1108_s11 }
 0x173   : > { %s1404_s11 = smov %s1251_s28  ;;  %s1405_s12 = smov %s1116_s13 }
 0x174   : > { %s1406_s13 = smov %s1408_s25  ;;  %18 = sbr.rel (!%p16_p5) target bundleno = 7 (0x7), region = 86 }
 0x17b   :  { %631 = vsyncpa [#allocation4], 1 }
 0x17c   :  { %633 = vsyncpa [#allocation4 + $0x1], 1 }
 0x17d   :  { %634 = vsyncpa [#allocation7], 1 }
 0x17e   :  { %635 = vsyncpa [#allocation5], 1 }
 0x17f   :  { %637 = vsyncpa [#allocation5 + $0x1], 1 }

</bundles_post_ra>
